<compile_context>
chip_gen: v7x
topology: tpu7x:2x2x1
jax: 0.10.0
libtpu: 0.0.40
codegen_flags: <defaults>
</compile_context>

<pallas_src>
import jax
import jax.numpy as jnp
import numpy as np
from jax.experimental import pallas as pl
from jax.experimental.pallas import tpu as pltpu

_LANE = 128
_MAX_ROW_TILE = 2048   # (row_tile, 1) scale/bias blocks pad to 128 lanes (~512 B/row)


def _normalize_kernel(scale_ref, bias_ref, x_ref, o_ref):
    """Elementwise per-row normalization.

    x_ref:     (R, L) tile of pixels (any int/uint/float dtype).
    scale_ref: (R, 1) per-row scale  = 1/(255*std[channel_of_row]).
    bias_ref:  (R, 1) per-row bias   = -mean[channel_of_row]/std[channel_of_row].
    Single fused multiply-add on the VPU; lane broadcast of (R,1) is cheap.
    """
    x = x_ref[...].astype(jnp.float32)                     # batch.float()
    y = x * scale_ref[...] + bias_ref[...]
    o_ref[...] = y.astype(o_ref.dtype)


def _round_down(x, m):
    return (x // m) * m


def _round_up(x, m):
    return ((x + m - 1) // m) * m


def _target_out_elems():
    """Per-grid-step f32 output element budget, by TPU generation."""
    try:
        kind = jax.devices()[0].device_kind.lower()
    except Exception:  # unknown backend / interpret mode
        kind = ""
    if "v7" in kind:
        return 2 * 1024 * 1024   # ~8 MiB out: amortize ~0.35us/step vs 3.2 TB/s HBM
    if "v6" in kind:
        return 1024 * 1024       # ~4 MiB out: ample headroom in 128 MiB VMEM
    return 512 * 1024            # v5e / unknown: ~2 MiB out, fits 16 MiB scoped default


def _pick_tiles(rows, cols, sub, target_elems):
    """Pick (row_tile, col_tile) with row_tile * col_tile <= target_elems."""
    # Column tile: lane-dense multiple of 128 (or full dim when cols <= 128),
    # capped so that even the minimum row tile keeps the product in budget.
    row_floor = rows if rows <= sub else sub
    col_cap = max(_LANE, _round_down(max(_LANE, target_elems // row_floor), _LANE))
    if cols <= _LANE:
        col_tile = cols                       # full dim (legal even if lane-sparse)
    else:
        col_tile = min(_round_down(cols, _LANE), col_cap)

    # Row tile: spend whatever element budget remains.
    if rows <= sub:
        row_tile = rows                       # full dim
    else:
        want = max(sub, target_elems // max(col_tile, 1))
        row_tile = max(sub, min(_round_down(want, sub),
                                _round_down(rows, sub),
                                _MAX_ROW_TILE))

    # If the whole problem fits in one grid step, split the column (or row)
    # axis so v7x's second TensorCore gets work; harmless on v5e/v6e.
    if pl.cdiv(rows, row_tile) * pl.cdiv(cols, col_tile) == 1:
        if col_tile > _LANE:
            col_tile = max(_LANE, _round_up(pl.cdiv(col_tile, 2), _LANE))
        elif rows > sub and row_tile >= 2 * sub:
            row_tile = max(sub, _round_down(row_tile // 2, sub))
    return row_tile, col_tile


def _vmem_limit_bytes(row_tile, col_tile, in_itemsize, out_itemsize):
    """Explicit scoped-VMEM request derived from the actual block footprint."""
    pix = 2 * row_tile * col_tile * (in_itemsize + out_itemsize)   # double-buffered in+out
    sb = 2 * 2 * row_tile * _LANE * 4                              # scale+bias, lane-padded
    need = pix + sb
    # 25% + 2 MiB headroom; never below the v5e default, never above v7x physical.
    return int(min(max(need + need // 4 + (2 << 20), 16 << 20), 64 << 20))


def image_normalize(batch, mean, std, out_dtype=jnp.float32):
    """Pallas equivalent of ImageNormalizer(mean, std, channel_first=True)(batch).

    batch: (N, C, H, W), any integer or float dtype (uint8 preferred for perf).
    mean, std: length-C per-channel statistics.
    out_dtype: jnp.float32 matches the PyTorch reference exactly; jnp.bfloat16
      is an optional bandwidth-saving variant (~1.6x with uint8 input) with
      relaxed output precision.
    """
    N, C, H, W = batch.shape
    mean = jnp.asarray(mean, jnp.float32).reshape(C)
    std = jnp.asarray(std, jnp.float32).reshape(C)

    # Fold /255 and the per-channel (x - mean)/std into a single scale/bias.
    scale_c = 1.0 / (255.0 * std)                # (C,)
    bias_c = -mean / std                         # (C,)

    rows, cols = N * C, H * W
    # Per-(n, c) row statistics; channel of row r is r % C.
    scale = jnp.tile(scale_c, N).reshape(rows, 1)
    bias = jnp.tile(bias_c, N).reshape(rows, 1)

    # Lane-dense 2D view of the batch.
    x2 = batch.reshape(rows, cols)

    in_itemsize = jnp.dtype(batch.dtype).itemsize
    out_itemsize = jnp.dtype(out_dtype).itemsize
    sub = {1: 32, 2: 16}.get(in_itemsize, 8)     # sublane packing of input dtype

    row_tile, col_tile = _pick_tiles(rows, cols, sub, _target_out_elems())
    grid = (pl.cdiv(rows, row_tile), pl.cdiv(cols, col_tile))

    out2 = pl.pallas_call(
        _normalize_kernel,
        out_shape=jax.ShapeDtypeStruct((rows, cols), out_dtype),
        grid=grid,
        in_specs=[
            pl.BlockSpec((row_tile, 1), lambda i, j: (i, 0)),           # scale
            pl.BlockSpec((row_tile, 1), lambda i, j: (i, 0)),           # bias
            pl.BlockSpec((row_tile, col_tile), lambda i, j: (i, j)),    # pixels
        ],
        out_specs=pl.BlockSpec((row_tile, col_tile), lambda i, j: (i, j)),
        compiler_params=pltpu.CompilerParams(
            dimension_semantics=("parallel", "parallel"),
            vmem_limit_bytes=_vmem_limit_bytes(
                row_tile, col_tile, in_itemsize, out_itemsize)),
    )(scale, bias, x2)

    return out2.reshape(N, C, H, W)


if __name__ == "__main__":
    key = jax.random.PRNGKey(0)

    # Small, module-consistent shapes: batch=2, channels=4, spatial=16x16.
    N, C, H, W = 2, 4, 16, 16
    # uint8 pixel values in [0, 255] (the .float() cast happens inside the kernel).
    x = jax.random.randint(key, (N, C, H, W), 0, 256, dtype=jnp.int32).astype(jnp.uint8)

    # Deterministic per-channel statistics (ImageNet-like, extended to 4 channels).
    mean = np.asarray([0.485, 0.456, 0.406, 0.50], dtype=np.float32)
    std = np.asarray([0.229, 0.224, 0.225, 0.25], dtype=np.float32)

    out = image_normalize(x, mean, std)
    out = jax.block_until_ready(out)

    # Pure-JAX reference (mirrors the PyTorch forward exactly). The fused
    # scale/bias formulation differs only by a few ulps.
    ref = (x.astype(jnp.float32) / 255.0
           - mean[None, :, None, None]) / std[None, :, None, None]
    np.testing.assert_allclose(np.asarray(out), np.asarray(ref), rtol=1e-5, atol=1e-5)

    print("KERNEL_OK")
</pallas_src>

<mosaic_0001>
module attributes {stable_mosaic.version = 11 : i64} {
  func.func @_normalize_kernel(%arg0: i32, %arg1: i32, %arg2: memref<8x1xf32, #tpu.memory_space<vmem>>, %arg3: memref<8x1xf32, #tpu.memory_space<vmem>>, %arg4: memref<8x128xi8, #tpu.memory_space<vmem>>, %arg5: memref<8x128xf32, #tpu.memory_space<vmem>>) attributes {dimension_semantics = [#tpu.dimension_semantics<parallel>, #tpu.dimension_semantics<parallel>], iteration_bounds = array<i64: 1, 2>, scalar_prefetch = 0 : i64, scratch_operands = 0 : i64, tpu.core_type = #tpu.core_type<tc>, window_params = [{transform_indices = @transform_0, window_bounds = array<i64: 8, 1>}, {transform_indices = @transform_1, window_bounds = array<i64: 8, 1>}, {transform_indices = @transform_2, window_bounds = array<i64: 8, 128>}, {transform_indices = @transform_3, window_bounds = array<i64: 8, 128>}]} {
    %c0 = arith.constant 0 : index
    %c0_0 = arith.constant 0 : index
    %0 = vector.load %arg4[%c0, %c0_0] : memref<8x128xi8, #tpu.memory_space<vmem>>, vector<8x128xi8>
    %1 = arith.uitofp %0 : vector<8x128xi8> to vector<8x128xf32>
    %c0_1 = arith.constant 0 : index
    %c0_2 = arith.constant 0 : index
    %2 = vector.load %arg2[%c0_1, %c0_2] : memref<8x1xf32, #tpu.memory_space<vmem>>, vector<8x1xf32>
    %3 = vector.broadcast %2 : vector<8x1xf32> to vector<8x128xf32>
    %4 = arith.mulf %1, %3 : vector<8x128xf32>
    %c0_3 = arith.constant 0 : index
    %c0_4 = arith.constant 0 : index
    %5 = vector.load %arg3[%c0_3, %c0_4] : memref<8x1xf32, #tpu.memory_space<vmem>>, vector<8x1xf32>
    %6 = vector.broadcast %5 : vector<8x1xf32> to vector<8x128xf32>
    %7 = arith.addf %4, %6 : vector<8x128xf32>
    %c0_5 = arith.constant 0 : index
    %c0_6 = arith.constant 0 : index
    %8 = vector.load %arg5[%c0_5, %c0_6] : memref<8x128xf32, #tpu.memory_space<vmem>>, vector<8x128xf32>
    tpu.vector_store %arg5[%c0_5, %c0_6], %7 {strides = array<i32>} : memref<8x128xf32, #tpu.memory_space<vmem>>, vector<8x128xf32>,
    return
  }
  func.func @transform_0(%arg0: i32, %arg1: i32) -> (i32, i32) {
    %c0_i32 = arith.constant 0 : i32
    %c0_i32_0 = arith.constant 0 : i32
    return %arg0, %c0_i32 : i32, i32
  }
  func.func @transform_1(%arg0: i32, %arg1: i32) -> (i32, i32) {
    %c0_i32 = arith.constant 0 : i32
    %c0_i32_0 = arith.constant 0 : i32
    return %arg0, %c0_i32 : i32, i32
  }
  func.func @transform_2(%arg0: i32, %arg1: i32) -> (i32, i32) {
    %c0_i32 = arith.constant 0 : i32
    return %arg0, %arg1 : i32, i32
  }
  func.func @transform_3(%arg0: i32, %arg1: i32) -> (i32, i32) {
    %c0_i32 = arith.constant 0 : i32
    return %arg0, %arg1 : i32, i32
  }
}

</mosaic_0001>

<bundles_post_ra>
// kernel: tpu_custom_call.1
= control target key start
LH: loop header
LB: loop body
LE: loop exit
PB: predicated region body
PF: predicated region fallthrough
CT: control target
= control target key end

     0   :  { %8 = vsyncpa [#allocation3], 0  ;;  %s658_s0 = inlined_call_operand.vmem [shape: f32[8,1], index: 0, kind: input, shape index: {}]   ;;  %s659_s1 = inlined_call_operand.vmem [shape: f32[8,1], index: 1, kind: input, shape index: {}]   ;;  %s660_s2 = inlined_call_operand.vmem [shape: u8[8,256], index: 2, kind: input, shape index: {}]   ;;  %s661_s3 = inlined_call_operand.hbm [shape: f32[8,256], index: 3, kind: output, shape index: {}]  }
   0x1   :  { %10 = vsyncpa [#allocation3 + $0x1], 0  ;;  %s540_s12 = smov 0   ;;  %s542_s13 = smov 0  }
   0x2   :  { %s544_s14 = smov 0   ;;  %s546_s15 = smov 0  }
   0x3   :  { %s548_s16 = smov 0   ;;  %s550_s17 = smov 0  }
   0x4 LB: > { %s368_s18 = sadd.s32 4294967295, %s516_s17   ;;  %s369_s19 = sadd.s32 4294967294, %s516_s17   ;;  %s516_s17 = sphi %s550_s17, %s16_s17   ;;  %s512_s16 = sphi %s548_s16, %s668_s16   ;;  %s508_s15 = sphi %s546_s15, %s667_s15   ;;  %s504_s14 = sphi %s544_s14, %s666_s14   ;;  %s500_s13 = sphi %s542_s13, %s665_s13   ;;  %s496_s12 = sphi %s540_s12, %s664_s12  }
   0x5   : > { %s25_s20 = sadd.s32 1, %s512_s16  ;;  %s117_s21 = sadd.s32 1, %s504_s14 }
   0x6   : > { %p26_p0 = scmp.ge.s32.totalorder %s25_s20, 2  ;;  %p127_p1 = scmp.ne.s32.totalorder %s504_s14, %s500_s13 }
   0x7   : > { %p128_p2 = scmp.eq.s32.totalorder %s368_s18, 1  ;;  %p133_p3 = scmp.ne.s32.totalorder %s500_s13, %s496_s12 }
   0x8   : > { %s670_s20 = smov (%p26_p0, %s25_s20), 0  ;;  %p134_p5 = scmp.eq.s32.totalorder %s369_s19, 1 }
   0x9   : > { %p580_p4 = por %p128_p2, %p127_p1  ;;  %s113_s23 = ssub.s32 %s512_s16, %s670_s20 }
   0xa   : > { %p374_p6 = scmp.ge.s32.totalorder %s516_s17, 1  ;;  %p115_p7 = scmp.eq.s32.totalorder %s113_s23, 0 }
   0xb   : > { %p587_p8 = por %p134_p5, %p133_p3  ;;  %p177_p9 = scmp.lt.s32.totalorder %s516_s17, 3 }
   0xc   : > { %s593_s25 = scalar_select %p115_p7, %s504_s14, %s117_s21  }
   0xd   : > { %p178_p10 = pnand %p374_p6, %p177_p9 }
   0xe   : > { %v232_v0 = vld [vmem:[%s658_s0] sm:$0xff] (!%p178_p10)  ;;  %v518_v1 = vmov (!%p178_p10), 0   ;;  %p222_p11 = scmp.lt.s32.totalorder (!%p178_p10), %s508_s15, 1  ;;  %s209_s8 = sand.u32 (!%p178_p10), 1, %s500_s13  }
   0xf   : > { %181 = sbr.rel (%p178_p10) target bundleno = 164 (0xa4), region = 32  ;;  %437 = vset.pattern.permute.xlu0 (!%p178_p10), %v518_v1  ;;  %v239_v2 = vld [vmem:[%s659_s1] sm:$0xff] (!%p178_p10)  ;;  %s375_s9 = sshll.u32 (!%p178_p10), %s209_s8, 3 }
  0x10   : > { %235 = vperm.xlu0 (!%p178_p10), %437, %v232_v0   ;;  %s378_s10 = sshll.u32 (!%p178_p10), %s508_s15, 7  ;;  %s211_s11 = scalar_lea.vmem (!%p178_p10), [#allocation2], %s375_s9 }
  0x11   : > { %s263_s18 = sshll.u32 (!%p178_p10), %s211_s11, 4  ;;  %s611_s23 = scalar_lea.hbm (!%p178_p10), %s661_s3, %s378_s10  ;;  %s613_s18 = int_to_ptr.vmem [resolvable:$true] %s263_s18 }
  0x12   : > { %s248_s26 = scalar_lea.sflag (!%p178_p10), [#allocation3], %s209_s8  ;;  %s438_s27 = scalar_lea.vmem (!%p178_p10), %s613_s18, 128 }
  0x13   : > { %p439_p12 = scmp.ne.s32.totalorder (!%p178_p10), %s613_s18, %s438_s27 }
  0x14   : > { %242 = vperm.xlu0 (!%p178_p10), %437, %v239_v2  }
  0x15   : > { %p440_p13 = pnand (!%p178_p10), %p439_p12, %p580_p4 }
  0x16   : > { %s223_s30 = scalar_select %p222_p11, %s508_s15, 1 }
  0x17   : > { %p441_p0 = pneg %p440_p13  ;;  %s519_s15 = smov [#allocation2]  }
  0x18   : > { %s376_s4 = sshll.u32 %s223_s30, 1  ;;  %s442_s28 = sshll.u32 %s519_s15, 4  ;;  %s443_s28 = int_to_ptr.vmem [resolvable:$false] %s442_s28 }
  0x19   : > { %s227_s7 = scalar_lea.vmem %s660_s2, %s376_s4  ;;  %s444_s29 = scalar_lea.vmem %s443_s28, 256 }
  0x1a   : > { %v228_v3 = vld [vmem:[%s227_s7] sm:$0x3]  ;;  %p445_p1 = scmp.lt.s32.totalorder %s613_s18, %s443_s28  ;;  %p446_p2 = scmp.lt.s32.totalorder %s444_s29, %s438_s27 }
  0x1b   : > { %v229_v4 = vunpack.c.0.s8 %v228_v3 }
  0x1c   : > { %p447_p3 = por %p446_p2, %p445_p1 }
  0x1d   : > { %v230_v5 = vand.u32 255, %v229_v4 }
  0x1e   : > { %p448_p5 = pnand %p447_p3, %p441_p0 }
  0x1f   : > { %v231_v6 = vcvt.s32.f32 %v230_v5 }
  0x8f   : > { %v236_v7 = vpop.permute.xlu0 %235 }
  0x90   : > { %v238_v8 = vmul.f32 %v236_v7, %v231_v6 }
  0x93   : > { %v243_v9 = vpop.permute.xlu0 %242 }
  0x94   : > { %v245_v10 = vadd.f32 %v243_v9, %v238_v8 }
  0x96   : > { %246 = vst [vmem:[%s211_s11] sm:$0xff] %v245_v10 }
  0x97   : > { %451 = shalt.err (!%p448_p5)
}
  0x98   : > { %s452_s30 = scalar_lea.hbm %s611_s23, 128  ;;  %s456_s6 = scalar_lea.hbm %s661_s3, 256 }
  0x99   : > { %p453_p6 = scmp.ne.s32.totalorder %s611_s23, %s452_s30  ;;  %p457_p10 = scmp.lt.u32.totalorder %s611_s23, %s661_s3 }
  0x9a   : > { %p458_p11 = scmp.lt.u32.totalorder %s456_s6, %s452_s30  ;;  %p460_p13 = scmp.lt.u32.totalorder %s452_s30, %s611_s23 }
  0x9b   : > { %p454_p7 = pnand %p453_p6, %p580_p4 }
  0x9c   : > { %p459_p12 = por %p458_p11, %p457_p10 }
  0x9d   : > { %p455_p9 = pneg %p454_p7 }
  0x9e   : > { %p461_p0 = por %p460_p13, %p459_p12 }
  0xa0   : > { %p462_p1 = pnand %p461_p0, %p455_p9 }
  0xa2   : > { %465 = shalt.err (!%p462_p1)
}
  0xa3   : > { %381 = dma.vmem_to_hbm [thread:$0]  (%p580_p4), %s613_s18, 128, %s611_s23, %s248_s26  }
  0xa4 PF: > { %p387_p2 = scmp.ge.s32.totalorder %s516_s17, 2  ;;  %s275_s9 = sand.u32 1, %s496_s12  }
  0xa5   : > { %s276_s10 = scalar_lea.sflag [#allocation3], %s275_s9 }
  0xa6   : > { %p384_p3 = pnand %p387_p2, %p587_p8 }
  0xa8   : > { %491 = dma.done.wait (!%p384_p3), %s276_s10, 128  }
  0xa9   : > { %493 = vsyncadd (!%p384_p3), %s276_s10, 4294967168  ;;  %s16_s17 = sadd.s32 1, %s516_s17   ;;  %s664_s12 = smov %s500_s13 }
  0xaa   : > { %p13_p5 = scmp.ge.s32.totalorder %s16_s17, 4   ;;  %s665_s13 = smov %s504_s14 }
  0xab   : > { %s666_s14 = smov %s593_s25  ;;  %s667_s15 = smov %s512_s16 }
  0xac   : > { %s668_s16 = smov %s670_s20  ;;  %15 = sbr.rel (!%p13_p5) target bundleno = 4 (0x4), region = 73 }
  0xb3   :  { %281 = vsyncpa [#allocation3], 1 }
  0xb4   :  { %283 = vsyncpa [#allocation3 + $0x1], 1 }

</bundles_post_ra>
